<compile_context>
chip_gen: v7x
topology: tpu7x:2x2x1
jax: 0.10.0
libtpu: 0.0.40
codegen_flags: <defaults>
</compile_context>

<pallas_src>
import jax
import jax.numpy as jnp
from jax.experimental import pallas as pl
from jax.experimental.pallas import tpu as pltpu


def _round_up(value: int, multiple: int) -> int:
    return ((value + multiple - 1) // multiple) * multiple


def _make_rgcn_kernel(resident_y: bool, k_tile: int):
    """out[tile_t] = sum over K-tiles of A[tile_t, tile_k] @ Y[tile_k]."""

    def kernel(a_ref, y_ref, out_ref):
        k = pl.program_id(1)

        @pl.when(k == 0)
        def _():
            out_ref[...] = jnp.zeros_like(out_ref)

        if resident_y:
            # Y is fully resident in VMEM (fetched once); slice the K-tile here.
            start = pl.multiple_of(k * k_tile, k_tile)
            y_tile = y_ref[pl.ds(start, k_tile), :]
        else:
            y_tile = y_ref[...]

        # bf16 x bf16 -> f32 on the MXU, accumulated into the resident f32
        # output block (output block index is constant over the reduction axis).
        out_ref[...] += jnp.dot(a_ref[...], y_tile,
                                preferred_element_type=jnp.float32)

    return kernel


def decomposition_forward(
    x,                # (num_nodes, input_dim) float32
    node_keep_mask,   # (num_nodes,) bool or None
    source,           # (num_edges,) int32
    target,           # (num_edges,) int32
    edge_type,        # (num_edges,) int32
    edge_weights,     # (num_edges,) float32 or None
    att,              # (num_relations, num_bases) float32
    bases,            # (num_bases, input_dim, output_dim) float32
    *,
    target_tile: int = 512,
    source_tile: int = 2048,
    compute_dtype=jnp.bfloat16,
    y_resident_max_bytes: int = 6 * 1024 * 1024,
):
    num_nodes, _ = x.shape
    num_bases = bases.shape[0]
    output_dim = bases.shape[-1]

    # ---- glue (plain JAX): per-edge coefficients -----------------------------
    if edge_weights is None:
        edge_weights = jnp.ones(source.shape, dtype=x.dtype)
    w_e = edge_weights
    if node_keep_mask is not None:
        # TODO(synk): exact mask placement differs per concrete Decomposition subclass.
        w_e = jnp.where(node_keep_mask[source], w_e, jnp.zeros_like(w_e))

    # ---- tiling / padding (lane-dense output, MXU-friendly node tiles) -------
    tt = min(target_tile, _round_up(num_nodes, 8))      # target-node tile (sublanes)
    ts = min(source_tile, _round_up(num_nodes, 128))    # K tile (lanes of A)
    nt_pad = _round_up(num_nodes, tt)
    ns_pad = _round_up(num_nodes, ts)
    dp = _round_up(output_dim, 128)                     # >=128 lanes for stores/MXU
    k_total = num_bases * ns_pad

    # ---- fold (edge weights x att) into a dense 2-D adjacency, basis folded
    # into the K axis; scatter directly into the compute dtype (single HBM
    # write of the big operand, no separate f32 build + bf16 cast pass).
    coef = (att[edge_type].astype(x.dtype) * w_e[:, None]).astype(compute_dtype)   # (E, B)
    cols = source[:, None] + ns_pad * jnp.arange(num_bases, dtype=source.dtype)[None, :]  # (E, B)
    adj = jnp.zeros((nt_pad, k_total), dtype=compute_dtype)
    adj = adj.at[target[:, None], cols].add(coef)                                  # (Nt, B*Ns)

    # Per-basis projected node features Y_b = X @ bases_b (tiny f32 einsum),
    # stacked along the folded K axis.
    y = jnp.einsum("ni,bio->bno", x.astype(jnp.float32), bases.astype(jnp.float32))
    y = jnp.pad(y, ((0, 0), (0, ns_pad - num_nodes), (0, dp - output_dim)))
    y = y.astype(compute_dtype).reshape(k_total, dp)                               # (B*Ns, Dp)

    # Keep Y fully resident in VMEM when small (avoids re-streaming it once per
    # target tile); otherwise stream it tiled along K.
    y_bytes = k_total * dp * jnp.dtype(compute_dtype).itemsize
    resident_y = y_bytes <= y_resident_max_bytes
    if resident_y:
        y_spec = pl.BlockSpec((k_total, dp), lambda i, k: (0, 0))
    else:
        y_spec = pl.BlockSpec((ts, dp), lambda i, k: (k, 0))

    grid = (nt_pad // tt, k_total // ts)

    cost = pl.CostEstimate(
        flops=2 * nt_pad * k_total * dp,
        transcendentals=0,
        bytes_accessed=(adj.size * adj.dtype.itemsize
                        + y.size * y.dtype.itemsize
                        + nt_pad * dp * 4),
    )

    out_padded = pl.pallas_call(
        _make_rgcn_kernel(resident_y, ts),
        out_shape=jax.ShapeDtypeStruct((nt_pad, dp), jnp.float32),
        grid_spec=pltpu.PrefetchScalarGridSpec(
            num_scalar_prefetch=0,
            grid=grid,
            in_specs=[
                # adjacency tile A[i, k]: (tt, ts)
                pl.BlockSpec((tt, ts), lambda i, k: (i, k)),
                y_spec,
            ],
            # output block constant over k -> resident f32 accumulator
            out_specs=pl.BlockSpec((tt, dp), lambda i, k: (i, 0)),
        ),
        compiler_params=pltpu.CompilerParams(
            dimension_semantics=("parallel", "arbitrary"),
            vmem_limit_bytes=32 * 1024 * 1024,
        ),
        cost_estimate=cost,
    )(adj, y)

    return out_padded[:num_nodes, :output_dim].astype(x.dtype)


def _reference_forward(x, node_keep_mask, source, target, edge_type, edge_weights, att, bases):
    """Pure-JAX per-edge reference (mirrors the PyTorch gather/matmul/index_add path)."""
    num_nodes = x.shape[0]
    output_dim = bases.shape[-1]
    w_rel = jnp.einsum("rb,bio->rio", att, bases)
    if edge_weights is None:
        edge_weights = jnp.ones(source.shape, dtype=x.dtype)
    w_e = edge_weights
    if node_keep_mask is not None:
        w_e = jnp.where(node_keep_mask[source], w_e, jnp.zeros_like(w_e))
    msgs = jnp.einsum("ei,eio->eo", x[source], w_rel[edge_type]) * w_e[:, None]
    out = jnp.zeros((num_nodes, output_dim), dtype=x.dtype)
    return out.at[target].add(msgs)


def _check(out, ref, tol=3e-2):
    # Streams are bf16 (f32 accumulation): compare relative to the reference scale.
    scale = float(jnp.maximum(jnp.max(jnp.abs(ref)), 1.0))
    err = float(jnp.max(jnp.abs(out - ref))) / scale
    assert err < tol, err


def _make_inputs(key, num_nodes, input_dim, output_dim, num_relations, num_bases, num_edges):
    k_x, k_b, k_a, k_s, k_t, k_r, k_w, k_m = jax.random.split(key, 8)
    x = jax.random.normal(k_x, (num_nodes, input_dim), dtype=jnp.float32)
    bases = jax.random.normal(k_b, (num_bases, input_dim, output_dim), dtype=jnp.float32) * 0.1
    att = jax.random.normal(k_a, (num_relations, num_bases), dtype=jnp.float32)
    source = jax.random.randint(k_s, (num_edges,), 0, num_nodes, dtype=jnp.int32)
    target = jax.random.randint(k_t, (num_edges,), 0, num_nodes, dtype=jnp.int32)
    edge_type = jax.random.randint(k_r, (num_edges,), 0, num_relations, dtype=jnp.int32)
    edge_weights = jax.random.uniform(k_w, (num_edges,), dtype=jnp.float32)
    node_keep_mask = jax.random.bernoulli(k_m, p=0.8, shape=(num_nodes,))
    return x, node_keep_mask, source, target, edge_type, edge_weights, att, bases


if __name__ == "__main__":
    key = jax.random.PRNGKey(0)
    k1, k2 = jax.random.split(key)

    # ---- Test 1: small, module-consistent shapes (single target tile) --------
    args1 = _make_inputs(k1, num_nodes=16, input_dim=32, output_dim=32,
                         num_relations=4, num_bases=2, num_edges=64)
    out1 = jax.block_until_ready(decomposition_forward(*args1))
    ref1 = _reference_forward(*args1)
    assert out1.shape == (16, 32)
    _check(out1, ref1)

    # ---- Test 2: exercises multi-tile accumulation, the parallel target axis,
    # non-128 output_dim padding, and both the resident-Y and streamed-Y paths.
    args2 = _make_inputs(k2, num_nodes=200, input_dim=40, output_dim=48,
                         num_relations=5, num_bases=3, num_edges=800)
    out2a = jax.block_until_ready(
        decomposition_forward(*args2, target_tile=128, source_tile=128))
    out2b = jax.block_until_ready(
        decomposition_forward(*args2, target_tile=128, source_tile=128,
                              y_resident_max_bytes=0))  # force streamed-Y path
    ref2 = _reference_forward(*args2)
    assert out2a.shape == (200, 48)
    _check(out2a, ref2)
    _check(out2b, ref2)

    print("KERNEL_OK")
</pallas_src>

<mosaic_0001>
module attributes {stable_mosaic.version = 11 : i64} {
  func.func @kernel(%arg0: i32, %arg1: i32, %arg2: memref<16x128xbf16, #tpu.memory_space<vmem>>, %arg3: memref<256x128xbf16, #tpu.memory_space<vmem>>, %arg4: memref<16x128xf32, #tpu.memory_space<vmem>>) attributes {dimension_semantics = [#tpu.dimension_semantics<parallel>, #tpu.dimension_semantics<arbitrary>], iteration_bounds = array<i64: 1, 2>, scalar_prefetch = 0 : i64, scratch_operands = 0 : i64, tpu.core_type = #tpu.core_type<tc>, window_params = [{transform_indices = @transform_0, window_bounds = array<i64: 16, 128>}, {pipeline_mode = #tpu.pipeline_mode<synchronous>, transform_indices = @transform_1, window_bounds = array<i64: 256, 128>}, {transform_indices = @transform_2, window_bounds = array<i64: 16, 128>}]} {
    %c0_i32 = arith.constant 0 : i32
    %0 = arith.cmpi eq, %arg1, %c0_i32 : i32
    %1 = arith.extui %0 : i1 to i32
    %c0_i32_0 = arith.constant 0 : i32
    %2 = arith.cmpi ne, %1, %c0_i32_0 : i32
    scf.if %2 {
      %cst_7 = arith.constant 0.000000e+00 : f32
      %12 = vector.broadcast %cst_7 : f32 to vector<16x128xf32>
      %c0_8 = arith.constant 0 : index
      %c0_9 = arith.constant 0 : index
      %13 = vector.load %arg4[%c0_8, %c0_9] : memref<16x128xf32, #tpu.memory_space<vmem>>, vector<16x128xf32>
      tpu.vector_store %arg4[%c0_8, %c0_9], %12 {strides = array<i32>} : memref<16x128xf32, #tpu.memory_space<vmem>>, vector<16x128xf32>,
    } else {
    }
    %c128_i32 = arith.constant 128 : i32
    %3 = arith.muli %arg1, %c128_i32 : i32
    %4 = tpu.assume_multiple %3, 128 : i32
    %5 = arith.index_cast %4 : i32 to index
    %c0 = arith.constant 0 : index
    %6 = vector.load %arg3[%5, %c0] : memref<256x128xbf16, #tpu.memory_space<vmem>>, vector<128x128xbf16>
    %c0_1 = arith.constant 0 : index
    %c0_2 = arith.constant 0 : index
    %7 = vector.load %arg4[%c0_1, %c0_2] : memref<16x128xf32, #tpu.memory_space<vmem>>, vector<16x128xf32>
    %c0_3 = arith.constant 0 : index
    %c0_4 = arith.constant 0 : index
    %8 = vector.load %arg2[%c0_3, %c0_4] : memref<16x128xbf16, #tpu.memory_space<vmem>>, vector<16x128xbf16>
    %cst = arith.constant dense<0.000000e+00> : vector<16x128xf32>
    %9 = tpu.matmul %8, %6, %cst {dimension_numbers = #tpu.dot_dimension_numbers<[1], [0], [0], [1], [0, 0, 1, 1], [], []>} : vector<16x128xbf16>, vector<128x128xbf16>, vector<16x128xf32> -> vector<16x128xf32>
    %10 = arith.addf %7, %9 : vector<16x128xf32>
    %c0_5 = arith.constant 0 : index
    %c0_6 = arith.constant 0 : index
    %11 = vector.load %arg4[%c0_5, %c0_6] : memref<16x128xf32, #tpu.memory_space<vmem>>, vector<16x128xf32>
    tpu.vector_store %arg4[%c0_5, %c0_6], %10 {strides = array<i32>} : memref<16x128xf32, #tpu.memory_space<vmem>>, vector<16x128xf32>,
    return
  }
  func.func @transform_0(%arg0: i32, %arg1: i32) -> (i32, i32) {
    %c0_i32 = arith.constant 0 : i32
    return %arg0, %arg1 : i32, i32
  }
  func.func @transform_1(%arg0: i32, %arg1: i32) -> (i32, i32) {
    %c0_i32 = arith.constant 0 : i32
    %c0_i32_0 = arith.constant 0 : i32
    %c0_i32_1 = arith.constant 0 : i32
    return %c0_i32, %c0_i32_0 : i32, i32
  }
  func.func @transform_2(%arg0: i32, %arg1: i32) -> (i32, i32) {
    %c0_i32 = arith.constant 0 : i32
    %c0_i32_0 = arith.constant 0 : i32
    return %arg0, %c0_i32 : i32, i32
  }
}

</mosaic_0001>

<bundles_post_ra>
// kernel: tpu_custom_call.1
= control target key start
LH: loop header
LB: loop body
LE: loop exit
PB: predicated region body
PF: predicated region fallthrough
CT: control target
= control target key end

     0   :  { %7 = vsyncpa [#allocation3], 0  ;;  %s917_s0 = inlined_call_operand.hbm [shape: bf16[16,256], index: 0, kind: input, shape index: {}]   ;;  %s918_s1 = inlined_call_operand.hbm [shape: bf16[256,128], index: 1, kind: input, shape index: {}]   ;;  %s919_s2 = inlined_call_operand.hbm [shape: f32[16,128], index: 2, kind: output, shape index: {}]  }
   0x1   :  { %9 = vsyncpa [#allocation3 + $0x1], 0 }
   0x2   :  { %10 = vsyncpa [#allocation6], 0 }
   0x3   :  { %11 = vsyncpa [#allocation4], 0  ;;  %s720_s9 = smov 0   ;;  %s722_s10 = smov 0  }
   0x4   :  { %s724_s11 = smov 0   ;;  %s726_s12 = smov 0  }
   0x5   :  { %s728_s13 = smov 0   ;;  %s730_s14 = smov 0  }
   0x6 LB: > { %s406_s15 = sadd.s32 4294967295, %s692_s14   ;;  %p45_p0 = scmp.ne.s32.totalorder %s680_s11, %s676_s10  ;;  %s692_s14 = sphi %s730_s14, %s17_s14   ;;  %s688_s13 = sphi %s728_s13, %s939_s13   ;;  %s684_s12 = sphi %s726_s12, %s938_s12   ;;  %s680_s11 = sphi %s724_s11, %s937_s11   ;;  %s676_s10 = sphi %s722_s10, %s936_s10   ;;  %s672_s9 = sphi %s720_s9, %s935_s9  }
   0x7   : > { %p46_p1 = scmp.eq.s32.totalorder %s692_s14, 0  ;;  %p51_p2 = scmp.ne.s32.totalorder %s676_s10, %s672_s9 }
   0x8   : > { %p755_p3 = scmp.eq.s32.totalorder %s406_s15, 0  ;;  %p407_p4 = scmp.ge.s32.totalorder %s692_s14, 1 }
   0x9   : > { %p47_p5 = por %p46_p1, %p45_p0  ;;  %p109_p6 = scmp.lt.s32.totalorder %s692_s14, 3 }
   0xa   : > { %s925_s16 = scalar_select %p755_p3, 1, 0 }
   0xb   : > { %p763_p7 = por %p755_p3, %p51_p2  ;;  %p767_p8 = pnand %p407_p4, %p109_p6 }
   0xc   : > { %s694_s19 = smov [#allocation5]   ;;  %p479_p11 = scmp.lt.s32.totalorder %s692_s14, 2 }
   0xd   : > { %s926_s17 = scalar_select %p763_p7, 1, 0 }
   0xe   : > { %s927_s18 = scalar_select %p767_p8, 1, 0 }
   0xf   : > { %s121_s20 = sshll.u32 %s694_s19, 4  ;;  %p470_p9 = pneg %p767_p8  ;;  %s122_s20 = int_to_ptr.vmem [resolvable:$true] %s121_s20 }
  0x10   : > { %s38_s22 = sadd.s32 1, %s680_s11  ;;  %p781_p12 = pnand %p479_p11, %p47_p5 }
  0x11   : > { %p775_p10 = pnand %p470_p9, %p755_p3  ;;  %s550_s26 = scalar_lea.hbm %s918_s1, 2048 }
  0x12   : > { %s929_s23 = scalar_select %p781_p12, 1, 0 }
  0x13   : > { %p551_p13 = scmp.ne.s32.totalorder %s918_s1, %s550_s26  ;;  %p552_p0 = pneg %p775_p10 }
  0x14   : > { %p557_p4 = scmp.lt.u32.totalorder %s550_s26, %s918_s1 }
  0x15   : > { %p553_p1 = pnand %p552_p0, %p551_p13 }
  0x17   : > { %p554_p2 = pneg %p553_p1 }
  0x19   : > { %p559_p5 = pnand %p557_p4, %p554_p2 }
  0x1b   : > { %562 = shalt.err (!%p559_p5)
}
  0x1c   : > { %s563_s3 = scalar_lea.vmem %s122_s20, 2048  ;;  %p571_p3 = scmp.lt.s32.totalorder %s122_s20, %s122_s20 }
  0x1d   : > { %p564_p6 = scmp.ne.s32.totalorder %s122_s20, %s563_s3  ;;  %p572_p7 = scmp.lt.s32.totalorder %s563_s3, %s563_s3 }
  0x1f   : > { %p566_p9 = pnand %p564_p6, %p552_p0  ;;  %p573_p8 = por %p572_p7, %p571_p3 }
  0x21   : > { %p567_p11 = pneg %p566_p9 }
  0x23   : > { %p574_p12 = pnand %p573_p8, %p567_p11 }
  0x25   : > { %577 = shalt.err (!%p574_p12)
}
  0x26   : > { %s695_s4 = smov 64   ;;  %s696_s5 = smov 4  }
  0x27   : > { %473 = dma.hbm_to_vmem [thread:$0]  (!%p775_p10), %s918_s1, 2048, %s122_s20, [#allocation6], %s695_s4, %s695_s4, %s696_s5  }
  0x28   : > { %s26_s8 = sadd.s32 1, %s688_s13  ;;  %s135_s9 = sand.u32 1, %s680_s11  }
  0x29   : > { %p27_p3 = scmp.ge.s32.totalorder %s26_s8, 2  ;;  %s410_s19 = sshll.u32 %s135_s9, 3 }
  0x2a   : > { %s411_s24 = sshll.u32 %s688_s13, 6  ;;  %s139_s20 = scalar_lea.vmem [#allocation2], %s410_s19 }
  0x2b   : > { %s941_s8 = smov (%p27_p3, %s26_s8), 0  ;;  %s812_s21 = scalar_lea.hbm %s917_s0, %s411_s24 }
  0x2c   : > { %s34_s27 = ssub.s32 %s688_s13, %s941_s8  ;;  %s148_s28 = sshll.u32 %s139_s20, 4  ;;  %s816_s28 = int_to_ptr.vmem [resolvable:$true] %s148_s28 }
  0x2d   : > { %p36_p7 = scmp.eq.s32.totalorder %s34_s27, 0  ;;  %s823_s30 = scalar_lea.sflag [#allocation3], %s135_s9 }
  0x2e   : > { %s578_s3 = scalar_lea.hbm %s812_s21, 128  ;;  %p930_p10 = scmp.ne.s32.totalorder %s929_s23, 0 }
  0x2f   : > { %s821_s29 = scalar_select %p36_p7, %s680_s11, %s38_s22  }
  0x30   : > { %p579_p8 = scmp.ne.s32.totalorder %s812_s21, %s578_s3  ;;  %p580_p12 = pneg %p930_p10 }
  0x31   : > { %s583_s19 = scalar_lea.hbm %s917_s0, 256  ;;  %p584_p1 = scmp.lt.u32.totalorder %s812_s21, %s917_s0 }
  0x32   : > { %p581_p13 = pnand %p580_p12, %p579_p8  ;;  %p585_p2 = scmp.lt.u32.totalorder %s583_s19, %s578_s3 }
  0x33   : > { %p587_p5 = scmp.lt.u32.totalorder %s578_s3, %s812_s21 }
  0x34   : > { %p582_p0 = pneg %p581_p13  ;;  %p586_p4 = por %p585_p2, %p584_p1 }
  0x36   : > { %p588_p6 = por %p587_p5, %p586_p4 }
  0x38   : > { %p589_p9 = pnand %p588_p6, %p582_p0 }
  0x3a   : > { %592 = shalt.err (!%p589_p9)
}
  0x3b   : > { %s593_s22 = scalar_lea.vmem %s816_s28, 128  ;;  %s697_s9 = smov [#allocation2]  }
  0x3c   : > { %p594_p11 = scmp.ne.s32.totalorder %s816_s28, %s593_s22  ;;  %s598_s26 = sshll.u32 %s697_s9, 4  ;;  %s599_s26 = int_to_ptr.vmem [resolvable:$false] %s598_s26 }
  0x3d   : > { %s600_s27 = scalar_lea.vmem %s599_s26, 256  ;;  %p601_p8 = scmp.lt.s32.totalorder %s816_s28, %s599_s26 }
  0x3e   : > { %p596_p3 = pnand %p594_p11, %p580_p12  ;;  %p602_p13 = scmp.lt.s32.totalorder %s600_s27, %s593_s22 }
  0x40   : > { %p597_p7 = pneg %p596_p3  ;;  %p603_p1 = por %p602_p13, %p601_p8 }
  0x42   : > { %p604_p2 = pnand %p603_p1, %p597_p7 }
  0x44   : > { %607 = shalt.err (!%p604_p2)
}
  0x45   : > { %s698_s20 = smov 128   ;;  %p931_p12 = scmp.ne.s32.totalorder %s927_s18, 0 }
  0x46   : > { %477 = dma.hbm_to_vmem [thread:$0]  (!%p930_p10), %s812_s21, 128, %s816_s28, %s823_s30, %s698_s20, %s695_s4, %s696_s5  }
  0x47   : > { %160 = sbr.rel (%p931_p12) target bundleno = 359 (0x167), region = 28  ;;  %s162_s3 = sand.u32 (!%p931_p12), 1, %s676_s10  }
  0x48   : > { %s856_s6 = sshll.u32 (!%p931_p12), %s162_s3, 3  ;;  %s163_s7 = scalar_lea.sflag (!%p931_p12), [#allocation3], %s162_s3 }
  0x49   : > { %s166_s19 = scalar_lea.vmem (!%p931_p12), [#allocation2], %s856_s6  ;;  %p932_p0 = scmp.ne.s32.totalorder (!%p931_p12), %s926_s17, 0 }
  0x4e   : > { %659 = dma.done.wait (%p932_p0), %s163_s7, 128  }
  0x4f   : > { %661 = vsyncadd (%p932_p0), %s163_s7, 4294967168  ;;  %p933_p4 = scmp.ne.s32.totalorder %s925_s16, 0 }
  0x51   : > { %663 = dma.done.wait (%p933_p4), [#allocation6], 2048  }
  0x52   : > { %665 = vsyncadd (%p933_p4), [#allocation6], 4294965248  ;;  %p415_p10 = scmp.ne.s32.totalorder %s684_s12, 0 }
  0x53   : > { %v699_v0 = vmov (!%p415_p10), 0.0  }
  0x54   : > { %192 = sbr.rel (%p415_p10) target bundleno = 91 (0x5b), region = 40  ;;  %193 = vst [vmem:[#allocation7] sm:$0xff] (!%p415_p10), %v699_v0  ;;  %194 = vst [vmem:[#allocation7 + $0x8] sm:$0xff] (!%p415_p10), %v699_v0 }
  0x5b PF: > { %s416_s18 = sshll.u32 %s684_s12, 7  ;;  %v700_v1 = vmov 0.0   ;;  %vm701_vm0 = vmmov 0   ;;  %v549_v10 = vld [vmem:[%s166_s19] sm:$0xff]   ;;  %v216_v11 = vld [vmem:[#allocation7] sm:$0xff]  ;;  %s702_s12 = smov [#allocation7]  }
  0x5c   : > { %440 = vmatprep.subr.bf16.mxu0 %v700_v1  ;;  %s196_s23 = sshra.s32 %s416_s18, 3  ;;  %456 = vmatprep.mubr.msk.bf16.mxu0 %vm701_vm0, %v700_v1  ;;  %s328_s16 = sshll.u32 %s702_s12, 4  ;;  %v217_v13 = vld [vmem:[#allocation7 + $0x8] sm:$0xff]  ;;  %s329_s16 = int_to_ptr.vmem [resolvable:$true] %s328_s16 }
  0x5d   : > { %s417_s17 = sshll.u32 %s196_s23, 2  ;;  %p873_p5 = scmp.eq.s32.totalorder %s406_s15, 1 }
  0x5e   : > { %s199_s4 = scalar_lea.vmem [#allocation5], %s417_s17  ;;  %s608_s21 = scalar_lea.vmem %s329_s16, 256 }
  0x5f   : > { %v541_v2 = vld [vmem:[%s199_s4] sm:$0xff]   ;;  %v542_v3 = vld [vmem:[%s199_s4 + $0x8] sm:$0xff]   ;;  %v543_v4 = vld [vmem:[%s199_s4 + $0x10] sm:$0xff]   ;;  %p609_p6 = scmp.ne.s32.totalorder %s329_s16, %s608_s21  ;;  %p615_p3 = scmp.lt.s32.totalorder %s329_s16, %s329_s16 }
  0x60   : > { %441 = vmatpush3.bf16.msra.mxu0 %v541_v2  ;;  %v544_v5 = vld [vmem:[%s199_s4 + $0x18] sm:$0xff]   ;;  %v545_v6 = vld [vmem:[%s199_s4 + $0x20] sm:$0xff]   ;;  %v546_v7 = vld [vmem:[%s199_s4 + $0x28] sm:$0xff]   ;;  %p616_p7 = scmp.lt.s32.totalorder %s608_s21, %s608_s21 }
  0x61   : > { %442 = vmatprep.subr.bf16.mxu0 %v700_v1  ;;  %v547_v8 = vld [vmem:[%s199_s4 + $0x30] sm:$0xff]   ;;  %v548_v9 = vld [vmem:[%s199_s4 + $0x38] sm:$0xff]   ;;  %p610_p9 = pnand %p609_p6, %p873_p5 }
  0x62   : > { %p617_p8 = por %p616_p7, %p615_p3 }
  0x63   : > { %p611_p11 = pneg %p610_p9 }
  0x64   : > { %443 = vmatpush3.bf16.msra.mxu0 %v542_v3 }
  0x65   : > { %444 = vmatprep.subr.bf16.mxu0 %v700_v1  ;;  %p618_p13 = pnand %p617_p8, %p611_p11 }
  0x68   : > { %445 = vmatpush3.bf16.msra.mxu0 %v543_v4 }
  0x69   : > { %446 = vmatprep.subr.bf16.mxu0 %v700_v1 }
  0x6c   : > { %447 = vmatpush3.bf16.msra.mxu0 %v544_v5 }
  0x6d   : > { %448 = vmatprep.subr.bf16.mxu0 %v700_v1 }
  0x70   : > { %449 = vmatpush3.bf16.msra.mxu0 %v545_v6 }
  0x71   : > { %450 = vmatprep.subr.bf16.mxu0 %v700_v1 }
  0x74   : > { %451 = vmatpush3.bf16.msra.mxu0 %v546_v7 }
  0x75   : > { %452 = vmatprep.subr.bf16.mxu0 %v700_v1 }
  0x78   : > { %453 = vmatpush3.bf16.msra.mxu0 %v547_v8 }
  0x79   : > { %454 = vmatprep.subr.bf16.mxu0 %v700_v1 }
  0x7c   : > { %455 = vmatpush3.bf16.msra.mxu0 %v548_v9 }
  0x7f   : > { %457 = vmatmul.mubr.bf16.vlgmr.msra.gmra.mrb[0].mxu0 %v549_v10 }
 0x152   : > { %v308_v12 = vpop.f32.mrb[0].mxu0 }
 0x153   : > { %v315_v14 = vadd.f32 %v308_v12, %v216_v11  ;;  %v458_v15 = vpop.f32.mrb[1].mxu0 }
 0x154   : > { %v311_v16 = vpop.f32.mrb[2].mxu0 }
 0x155   : > { %317 = vst [vmem:[#allocation7] sm:$0xff] %v315_v14  ;;  %v316_v17 = vadd.f32 %v311_v16, %v217_v13  ;;  %v459_v18 = vpop.f32.mrb[3].mxu0 }
 0x157   : > { %318 = vst [vmem:[#allocation7 + $0x8] sm:$0xff] %v316_v17 }
 0x158   : > { %621 = shalt.err (!%p618_p13)
}
 0x159   : > { %s622_s30 = scalar_lea.hbm %s919_s2, 256 }
 0x15a   : > { %p623_p1 = scmp.ne.s32.totalorder %s919_s2, %s622_s30  ;;  %p628_p0 = scmp.lt.u32.totalorder %s622_s30, %s919_s2 }
 0x15c   : > { %p624_p2 = pnand %p623_p1, %p873_p5 }
 0x15e   : > { %p625_p12 = pneg %p624_p2 }
 0x160   : > { %p630_p4 = pnand %p628_p0, %p625_p12 }
 0x162   : > { %633 = shalt.err (!%p630_p4)
}
 0x163   : > { %s703_s26 = smov 128   ;;  %s704_s27 = smov 8  }
 0x164   : > { %467 = dma.vmem_to_hbm [thread:$0]  (%p873_p5), %s329_s16, 256, %s919_s2, [#allocation4], %s703_s26, %s703_s26, %s704_s27  }
 0x165   : > { %667 = dma.done.wait (%p873_p5), [#allocation4], 256  }
 0x166   : > { %669 = vsyncadd (%p873_p5), [#allocation4], 4294967040 }
 0x167 PF: > { %s17_s14 = sadd.s32 1, %s692_s14   ;;  %s935_s9 = smov %s676_s10 }
 0x168   : > { %p14_p10 = scmp.ge.s32.totalorder %s17_s14, 4   ;;  %s936_s10 = smov %s680_s11 }
 0x169   : > { %s937_s11 = smov %s821_s29  ;;  %s938_s12 = smov %s688_s13 }
 0x16a   : > { %s939_s13 = smov %s941_s8  ;;  %16 = sbr.rel (!%p14_p10) target bundleno = 6 (0x6), region = 75 }
 0x171   :  { %344 = vsyncpa [#allocation3], 1 }
 0x172   :  { %346 = vsyncpa [#allocation3 + $0x1], 1 }
 0x173   :  { %347 = vsyncpa [#allocation6], 1 }
 0x174   :  { %348 = vsyncpa [#allocation4], 1 }
 0x175   :  { %350 = vsyncpa [#allocation4 + $0x1], 1 }

</bundles_post_ra>
